<compile_context>
chip_gen: v5e
topology: v5e:2x2
jax: 0.10.0
libtpu: 0.0.40
codegen_flags: <defaults>
</compile_context>

<pallas_src>
import functools

import jax
import jax.numpy as jnp
from jax.experimental import pallas as pl
from jax.experimental.pallas import tpu as pltpu


def _conv_relu_kernel(p_ref, w_ref, b_ref, o_ref):
    """One batch element per grid step (batch dim squeezed out of the refs).

    p_ref: (K, HW)    im2col patches, K = KH*KW*Cin, HW = Ho*Wo (lane-dense)
    w_ref: (Cout, K)  spectral-normalized weight, columns ordered (kh, kw, ci)
    b_ref: (Cout, 1)  bias (broadcasts along the lane axis)
    o_ref: (Cout, HW) output (lane-dense)
    """
    acc = jax.lax.dot_general(
        w_ref[...], p_ref[...],
        dimension_numbers=(((1,), (0,)), ((), ())),
        preferred_element_type=jnp.float32)
    o_ref[...] = jnp.maximum(acc + b_ref[...], 0.0)   # bias + ReLU epilogue


@functools.partial(jax.jit, static_argnames=("padding",))
def conv_with_activation(x_nchw, w_oihw, bias, *, padding):
    """x_nchw: (N, Cin, H, W) f32; w_oihw: (Cout, Cin, KH, KW) f32 (already SN'd).

    Returns (N, Cout, Ho, Wo) f32, matching the PyTorch module (stride=1).
    """
    # TODO(synk): stride=1 / dilation=1 / groups=1 hard-coded (module config);
    # generalizing requires different im2col strides.
    N, Cin, H, W = x_nchw.shape
    Cout, _, KH, KW = w_oihw.shape
    Ho = H + 2 * padding - KH + 1
    Wo = W + 2 * padding - KW + 1
    HW = Ho * Wo
    K = KH * KW * Cin

    # Pad + im2col directly in NCHW (fused by XLA under jit).
    x_pad = jnp.pad(
        x_nchw, ((0, 0), (0, 0), (padding, padding), (padding, padding)))
    taps = [x_pad[:, :, kh:kh + Ho, kw:kw + Wo]
            for kh in range(KH) for kw in range(KW)]        # each (N,Cin,Ho,Wo)
    patches = jnp.stack(taps, axis=1).reshape(N, K, HW)     # rows: (kh,kw,ci)

    # Weight flattened to match patch-row ordering: (Cout, KH*KW*Cin).
    w_mat = jnp.transpose(w_oihw, (0, 2, 3, 1)).reshape(Cout, K)
    b_col = bias.reshape(Cout, 1)

    out_flat = pl.pallas_call(
        _conv_relu_kernel,
        out_shape=jax.ShapeDtypeStruct((N, Cout, HW), jnp.float32),
        grid_spec=pltpu.PrefetchScalarGridSpec(
            num_scalar_prefetch=0,
            grid=(N,),
            in_specs=[
                pl.BlockSpec((None, K, HW), lambda n: (n, 0, 0)),
                pl.BlockSpec((Cout, K), lambda n: (0, 0)),
                pl.BlockSpec((Cout, 1), lambda n: (0, 0)),
            ],
            out_specs=pl.BlockSpec((None, Cout, HW), lambda n: (n, 0, 0)),
        ),
        compiler_params=pltpu.CompilerParams(
            dimension_semantics=("parallel",)),
    )(patches, w_mat, b_col)

    # Columns are ordered h*Wo + w, so this is a pure reshape (no transpose).
    return out_flat.reshape(N, Cout, Ho, Wo)


def _l2_normalize(v, eps=1e-12):
    return v / jnp.maximum(jnp.linalg.norm(v), eps)


def make_params(key, in_channels, out_channels, kernel_size):
    """Mirror the module __init__: kaiming_normal_ weight, default Conv2d bias,
    spectral_norm with one power iteration. Returns (w_oihw_sn, bias)."""
    # TODO(synk): torch's spectral_norm keeps persistent u/v buffers updated each
    # forward; here it is a deterministic init-time rescale (same math, one step).
    k_w, k_b, k_u = jax.random.split(key, 3)
    fan_in = in_channels * kernel_size * kernel_size

    # kaiming_normal_ (fan_in mode, relu gain): std = sqrt(2 / fan_in)
    w_oihw = jax.random.normal(
        k_w, (out_channels, in_channels, kernel_size, kernel_size),
        dtype=jnp.float32) * jnp.sqrt(2.0 / fan_in)

    # nn.Conv2d default bias init: U(-1/sqrt(fan_in), 1/sqrt(fan_in))
    bound = 1.0 / jnp.sqrt(fan_in)
    bias = jax.random.uniform(
        k_b, (out_channels,), minval=-bound, maxval=bound, dtype=jnp.float32)

    # Spectral norm: one power iteration on (Cout, Cin*KH*KW).
    w_mat = w_oihw.reshape(out_channels, -1)
    u = _l2_normalize(jax.random.normal(k_u, (out_channels,), jnp.float32))
    v = _l2_normalize(w_mat.T @ u)
    u = _l2_normalize(w_mat @ v)
    sigma = u @ (w_mat @ v)
    return w_oihw / sigma, bias


if __name__ == "__main__":
    # Module config: ConvWithActivation('conv', 4, 8, kernel_size=3, stride=1,
    #                                   padding=1, activation='relu', using_sn=True)
    N, Cin, H, W = 2, 4, 16, 16
    Cout, KSZ, PAD = 8, 3, 1

    key = jax.random.PRNGKey(0)
    k_x, k_p = jax.random.split(key)
    x = jax.random.normal(k_x, (N, Cin, H, W), dtype=jnp.float32)
    w_sn, bias = make_params(k_p, Cin, Cout, KSZ)

    out = conv_with_activation(x, w_sn, bias, padding=PAD)
    out = jax.block_until_ready(out)

    # Pure-JAX reference check (NCHW/OIHW, same spectral-normed weight).
    ref = jax.lax.conv_general_dilated(
        x, w_sn, window_strides=(1, 1),
        padding=((PAD, PAD), (PAD, PAD)),
        dimension_numbers=("NCHW", "OIHW", "NCHW"))
    ref = jnp.maximum(ref + bias[None, :, None, None], 0.0)

    assert out.shape == (N, Cout, H, W), out.shape
    assert jnp.allclose(out, ref, atol=1e-3, rtol=1e-3), "mismatch vs reference"

    print("KERNEL_OK")
</pallas_src>

<mosaic_0001>
module attributes {stable_mosaic.version = 11 : i64} {
  func.func @_conv_relu_kernel(%arg0: i32, %arg1: memref<1x36x256xf32, #tpu.memory_space<vmem>>, %arg2: memref<8x36xf32, #tpu.memory_space<vmem>>, %arg3: memref<8x1xf32, #tpu.memory_space<vmem>>, %arg4: memref<1x8x256xf32, #tpu.memory_space<vmem>>) attributes {dimension_semantics = [#tpu.dimension_semantics<parallel>], iteration_bounds = array<i64: 2>, scalar_prefetch = 0 : i64, scratch_operands = 0 : i64, tpu.core_type = #tpu.core_type<tc>, window_params = [{transform_indices = @transform_0, window_bounds = array<i64: 1, 36, 256>}, {pipeline_mode = #tpu.pipeline_mode<synchronous>, transform_indices = @transform_1, window_bounds = array<i64: 8, 36>}, {pipeline_mode = #tpu.pipeline_mode<synchronous>, transform_indices = @transform_2, window_bounds = array<i64: 8, 1>}, {transform_indices = @transform_3, window_bounds = array<i64: 1, 8, 256>}]} {
    %c0 = arith.constant 0 : index
    %c0_0 = arith.constant 0 : index
    %0 = vector.load %arg2[%c0, %c0_0] : memref<8x36xf32, #tpu.memory_space<vmem>>, vector<8x36xf32>
    %c0_1 = arith.constant 0 : index
    %c0_2 = arith.constant 0 : index
    %c0_3 = arith.constant 0 : index
    %1 = vector.load %arg1[%c0_1, %c0_2, %c0_3] : memref<1x36x256xf32, #tpu.memory_space<vmem>>, vector<1x36x256xf32>
    %2 = vector.shape_cast %1 : vector<1x36x256xf32> to vector<36x256xf32>
    %cst = arith.constant dense<0.000000e+00> : vector<8x256xf32>
    %3 = tpu.matmul %0, %2, %cst {dimension_numbers = #tpu.dot_dimension_numbers<[1], [0], [0], [1], [0, 0, 1, 1], [], []>} : vector<8x36xf32>, vector<36x256xf32>, vector<8x256xf32> -> vector<8x256xf32>
    %c0_4 = arith.constant 0 : index
    %c0_5 = arith.constant 0 : index
    %4 = vector.load %arg3[%c0_4, %c0_5] : memref<8x1xf32, #tpu.memory_space<vmem>>, vector<8x1xf32>
    %5 = vector.broadcast %4 : vector<8x1xf32> to vector<8x256xf32>
    %6 = arith.addf %3, %5 : vector<8x256xf32>
    %cst_6 = arith.constant 0.000000e+00 : f32
    %7 = vector.broadcast %cst_6 : f32 to vector<8x256xf32>
    %8 = arith.maximumf %6, %7 : vector<8x256xf32>
    %c0_7 = arith.constant 0 : index
    %c0_8 = arith.constant 0 : index
    %c0_9 = arith.constant 0 : index
    %9 = vector.load %arg4[%c0_7, %c0_8, %c0_9] : memref<1x8x256xf32, #tpu.memory_space<vmem>>, vector<1x8x256xf32>
    %10 = vector.shape_cast %9 : vector<1x8x256xf32> to vector<8x256xf32>
    %11 = vector.shape_cast %8 : vector<8x256xf32> to vector<1x8x256xf32>
    tpu.vector_store %arg4[%c0_7, %c0_8, %c0_9], %11 {strides = array<i32>} : memref<1x8x256xf32, #tpu.memory_space<vmem>>, vector<1x8x256xf32>,
    return
  }
  func.func @transform_0(%arg0: i32) -> (i32, i32, i32) {
    %c0_i32 = arith.constant 0 : i32
    %c0_i32_0 = arith.constant 0 : i32
    %c0_i32_1 = arith.constant 0 : i32
    return %arg0, %c0_i32, %c0_i32_0 : i32, i32, i32
  }
  func.func @transform_1(%arg0: i32) -> (i32, i32) {
    %c0_i32 = arith.constant 0 : i32
    %c0_i32_0 = arith.constant 0 : i32
    %c0_i32_1 = arith.constant 0 : i32
    return %c0_i32, %c0_i32_0 : i32, i32
  }
  func.func @transform_2(%arg0: i32) -> (i32, i32) {
    %c0_i32 = arith.constant 0 : i32
    %c0_i32_0 = arith.constant 0 : i32
    %c0_i32_1 = arith.constant 0 : i32
    return %c0_i32, %c0_i32_0 : i32, i32
  }
  func.func @transform_3(%arg0: i32) -> (i32, i32, i32) {
    %c0_i32 = arith.constant 0 : i32
    %c0_i32_0 = arith.constant 0 : i32
    %c0_i32_1 = arith.constant 0 : i32
    return %arg0, %c0_i32, %c0_i32_0 : i32, i32, i32
  }
}

</mosaic_0001>

<bundles_post_ra>
// kernel: conv_with_activation.1
= control target key start
LH: loop header
LB: loop body
LE: loop exit
PB: predicated region body
PF: predicated region fallthrough
CT: control target
= control target key end

     0   :  { %s353_s12 = smov 0   ;;  %s380_s0 = inlined_call_operand.vmem [shape: f32[2,36,256], index: 0, kind: input, shape index: {}]   ;;  %s381_s1 = inlined_call_operand.vmem [shape: f32[8,36], index: 1, kind: input, shape index: {}]   ;;  %s382_s2 = inlined_call_operand.vmem [shape: f32[8,1], index: 2, kind: input, shape index: {}]   ;;  %s383_s3 = inlined_call_operand.vmem [shape: f32[2,8,256], index: 3, kind: output, shape index: {}]  }
   0x1 LB: > { %s298_s13 = sadd.s32 4294967295, %s330_s12   ;;  %p302_p0 = scmp.ge.s32.totalorder %s330_s12, 1  ;;  %s330_s12 = sphi %s353_s12, %s13_s12  }
   0x2   : > { %p137_p1 = scmp.lt.s32.totalorder %s330_s12, 3 }
   0x4   : > { %p138_p2 = pnand %p302_p0, %p137_p1 }
   0x5   : > { %p161_p3 = scmp.lt.s32.totalorder (!%p138_p2), %s298_s13, 1 }
   0x6   : > { %141 = sbr.rel (%p138_p2) target bundleno = 157 (0x9d), region = 32 }
   0xb   : > { %v182_v0 = vld [vmem:[%s382_s2] sm:$0xff]  ;;  %v332_v1 = vmov 0   ;;  %s385_s13 = smov (!%p161_p3, %s298_s13), 1  ;;  %vm192_vm0 = vcmask 1043456   ;;  %vm188_vm1 = vcmask 293888  }
   0xc   : > { %323 = vset.pattern.permute.xlu0 %v332_v1  ;;  %s313_s16 = smul.u32 80, %s385_s13  ;;  %v171_v12 = vld [vmem:[%s381_s1] sm:$0xff]  ;;  %s312_s22 = sshll.u32 %s385_s13, 4 }
   0xd   : > { %185 = vperm.xlu0 %323, %v182_v0   ;;  %s170_s25 = scalar_lea.vmem %s383_s3, %s312_s22 }
   0xe   : > { %s165_s19 = scalar_lea.vmem %s380_s0, %s313_s16 }
   0xf   : > { %v180_v2 = vld [vmem:[%s165_s19 + $0x40] sm:$0xf]  ;;  %v181_v3 = vld [vmem:[%s165_s19 + $0x48] sm:$0xf]  ;;  %v178_v4 = vld [vmem:[%s165_s19 + $0x30] sm:$0xff] }
  0x10   : > { %306 = vmatpush.msk.msra.mxu0 %vm192_vm0, %v180_v2  ;;  %308 = vmatpush.msk.msra.mxu1 %vm192_vm0, %v181_v3  ;;  %v179_v5 = vld [vmem:[%s165_s19 + $0x38] sm:$0xff]  ;;  %v176_v6 = vld [vmem:[%s165_s19 + $0x20] sm:$0xff]  ;;  %v177_v7 = vld [vmem:[%s165_s19 + $0x28] sm:$0xff] }
  0x11   : > { %v174_v8 = vld [vmem:[%s165_s19 + $0x10] sm:$0xff]  ;;  %v175_v9 = vld [vmem:[%s165_s19 + $0x18] sm:$0xff]  ;;  %v172_v10 = vld [vmem:[%s165_s19] sm:$0xff] }
  0x12   : > { %211 = vmatpush.msra.mxu0 %v178_v4  ;;  %231 = vmatpush.msra.mxu1 %v179_v5  ;;  %v173_v11 = vld [vmem:[%s165_s19 + $0x8] sm:$0xff] }
  0x14   : > { %212 = vmatpush.msra.mxu0 %v176_v6  ;;  %232 = vmatpush.msra.mxu1 %v177_v7 }
  0x16   : > { %213 = vmatpush.msra.mxu0 %v174_v8  ;;  %233 = vmatpush.msra.mxu1 %v175_v9 }
  0x18   : > { %214 = vmatpush.msra.mxu0 %v172_v10  ;;  %234 = vmatpush.msra.mxu1 %v173_v11 }
  0x19   : > { %307 = vmatmul.msk.f32.vlgmr.msra.gmra.mxu0 %vm188_vm1, %v171_v12  ;;  %309 = vmatmul.msk.f32.vlgmr.msra.gmra.mxu1 %vm188_vm1, %v171_v12 }
  0x7f   : > { %v186_v13 = vpop.permute.xlu0 %185 }
  0x96   : > { %v216_v14 = vpop.f32.mrf.mxu0  ;;  %v236_v15 = vpop.f32.mrf.mxu1 }
  0x97   : > { %v217_v16 = vadd.f32 %v216_v14, %v186_v13  ;;  %v237_v17 = vadd.f32 %v236_v15, %v186_v13 }
  0x99   : > { %v239_v18 = vmax.f32 %v217_v16, 0.0  ;;  %v240_v19 = vmax.f32 %v237_v17, 0.0 }
  0x9b   : > { %241 = vst [vmem:[%s170_s25] sm:$0xff] %v239_v18 }
  0x9c   : > { %242 = vst [vmem:[%s170_s25 + $0x8] sm:$0xff] %v240_v19 }
  0x9d PF: > { %s13_s12 = sadd.s32 1, %s330_s12  }
  0x9e   : > { %p10_p4 = scmp.ge.s32.totalorder %s13_s12, 4  }
  0xa0   :  { %12 = sbr.rel (!%p10_p4) target bundleno = 1 (0x1), region = 62 }

</bundles_post_ra>
